<compile_context>
chip_gen: v6e
topology: v6e:2x2x1
jax: 0.10.0
libtpu: 0.0.40
codegen_flags: <defaults>
</compile_context>

<pallas_src>
import jax
import jax.numpy as jnp
from jax import lax
from jax.experimental import pallas as pl
from jax.experimental.pallas import tpu as pltpu


def _accumulate_sq(x_ref, c_block, acc):
    """acc + sum_c x_ref[c]^2 in f32, without materializing a (C, R, L) temp."""
    if c_block <= 16:                           # small C: static unrolled adds
        for c in range(c_block):
            slab = x_ref[c].astype(jnp.float32)
            acc = acc + slab * slab
    else:                                       # large C: visible loop
        def body(c, a):
            slab = x_ref[c].astype(jnp.float32)
            return a + slab * slab
        acc = lax.fori_loop(0, c_block, body, acc)
    return acc


def _make_kernel(c_block):
    def kernel(x_ref, o_ref):
        # x_ref: (c_block, tile_rows, lane)   o_ref: (tile_rows, lane)
        acc = jnp.zeros(o_ref.shape, jnp.float32)
        acc = _accumulate_sq(x_ref, c_block, acc)
        o_ref[...] = jnp.sqrt(acc).astype(o_ref.dtype)
    return kernel


def _make_kernel_chunked(c_block):
    def kernel(x_ref, o_ref, acc_ref):
        cc = pl.program_id(2)

        @pl.when(cc == 0)
        def _():
            acc_ref[...] = jnp.zeros_like(acc_ref)

        acc_ref[...] = _accumulate_sq(x_ref, c_block, acc_ref[...])

        @pl.when(cc == pl.num_programs(2) - 1)
        def _():
            o_ref[...] = jnp.sqrt(acc_ref[...]).astype(o_ref.dtype)
    return kernel


def l2_norm_dim1(x, *, max_lane=2048, max_in_block_bytes=16 << 20,
                 vmem_target_bytes=40 << 20, force_c_chunk=None):
    """Pallas TPU kernel computing x.norm(dim=1, p=2) for a 4-D NCHW tensor."""
    B, C, H, W = x.shape
    S = H * W
    itemsize = jnp.dtype(x.dtype).itemsize
    sublane = max(8, 32 // itemsize)            # 8 f32 / 16 bf16 / 32 int8

    # Pad the flattened spatial extent only when it is not 128-aligned.
    S_total = S if S % 128 == 0 else pl.cdiv(S, 128) * 128

    # Lane width: largest multiple of 128 dividing S_total (<= max_lane) whose
    # minimal (C, sublane, lane) input block still fits the soft block cap.
    lane_divs = [l for l in range(128, min(S_total, max_lane) + 1, 128)
                 if S_total % l == 0]
    lane = 128
    for l in reversed(lane_divs):
        if C * sublane * l * itemsize <= max_in_block_bytes:
            lane = l
            break
    rows = S_total // lane

    # Channel chunking (only for very large C that would blow past VMEM).
    if force_c_chunk is not None:
        assert C % force_c_chunk == 0
        c_chunk = force_c_chunk
    elif C * sublane * lane * itemsize > max_in_block_bytes:
        budget = max(1, max_in_block_bytes // (sublane * lane * itemsize))
        c_chunk = 1
        for d in range(min(C, budget), 0, -1):
            if C % d == 0:
                c_chunk = d
                break
    else:
        c_chunk = C
    chunked = c_chunk < C
    n_cc = C // c_chunk

    # Rows per grid step: fill ~vmem_target with the double-buffered blocks.
    per_row_bytes = (2 * c_chunk * lane * itemsize          # input  (x2 buffers)
                     + 2 * lane * itemsize                  # output (x2 buffers)
                     + (4 * lane if chunked else 0))        # f32 accumulator
    rows_budget = max(sublane,
                      (int(vmem_target_bytes // per_row_bytes) // sublane) * sublane)
    tile_rows = rows if rows <= rows_budget else rows_budget

    # v7x has 2 TensorCores sharded over "parallel" grid axes: make sure a
    # B == 1 call still yields >= 2 spatial grid steps when the shape allows.
    if B == 1 and pl.cdiv(rows, tile_rows) == 1 and rows >= 2 * sublane:
        tile_rows = max(sublane, ((rows // 2) // sublane) * sublane)
    n_rt = pl.cdiv(rows, tile_rows)        # last block may run OOB (stores masked)

    # Wrapper-side flatten; pad only in the rare non-128-aligned case.
    xf = x.reshape(B, C, S)
    if S_total != S:
        xf = jnp.pad(xf, ((0, 0), (0, 0), (0, S_total - S)))
    xr = xf.reshape(B, C, rows, lane)

    # Scoped-VMEM limit sized from actual need (never all of a v7x TC's 64 MiB).
    in_blk = c_chunk * tile_rows * lane * itemsize
    out_blk = tile_rows * lane * itemsize
    acc_blk = tile_rows * lane * 4 if chunked else 0
    vmem_needed = 2 * in_blk + 2 * out_blk + acc_blk
    vmem_limit = min(60 << 20, max(16 << 20, int(vmem_needed * 1.25) + (4 << 20)))

    if chunked:
        grid = (B, n_rt, n_cc)
        in_specs = [pl.BlockSpec((pl.Squeezed(), c_chunk, tile_rows, lane),
                                 lambda b, t, cc: (b, cc, t, 0))]
        out_specs = pl.BlockSpec((pl.Squeezed(), tile_rows, lane),
                                 lambda b, t, cc: (b, t, 0))
        scratch = (pltpu.VMEM((tile_rows, lane), jnp.float32),)
        dims = ("parallel", "parallel", "arbitrary")
        kernel = _make_kernel_chunked(c_chunk)
    else:
        grid = (B, n_rt)
        in_specs = [pl.BlockSpec((pl.Squeezed(), C, tile_rows, lane),
                                 lambda b, t: (b, 0, t, 0))]
        out_specs = pl.BlockSpec((pl.Squeezed(), tile_rows, lane),
                                 lambda b, t: (b, t, 0))
        scratch = ()
        dims = ("parallel", "parallel")
        kernel = _make_kernel(C)

    out = pl.pallas_call(
        kernel,
        out_shape=jax.ShapeDtypeStruct((B, rows, lane), x.dtype),
        grid_spec=pltpu.PrefetchScalarGridSpec(
            num_scalar_prefetch=0,
            grid=grid,
            in_specs=in_specs,
            out_specs=out_specs,
            scratch_shapes=scratch),
        compiler_params=pltpu.CompilerParams(
            dimension_semantics=dims,
            vmem_limit_bytes=vmem_limit),
        cost_estimate=pl.CostEstimate(
            flops=2 * B * C * S_total,
            transcendentals=B * S_total,
            bytes_accessed=(B * C * S_total + B * S_total) * itemsize),
    )(xr)

    out = out.reshape(B, S_total)
    if S_total != S:
        out = out[:, :S]
    return out.reshape(B, H, W)


def test_integral_loss_forward(s, x):
    """Mirrors TestIntegralLoss.forward(s, x): `s` is ignored."""
    del s  # unused, matching the PyTorch module
    return l2_norm_dim1(x)


if __name__ == "__main__":
    key = jax.random.PRNGKey(0)
    k_s, k_x = jax.random.split(key)

    # Primary check: small NCHW shape consistent with the module.
    B, C, H, W = 2, 4, 16, 16
    x = jax.random.normal(k_x, (B, C, H, W), dtype=jnp.float32)
    s = jax.random.normal(k_s, (B, C, H, W), dtype=jnp.float32)  # unused by forward

    out = test_integral_loss_forward(s, x)
    out = jax.block_until_ready(out)
    ref = jnp.sqrt(jnp.sum(x * x, axis=1))
    assert out.shape == (B, H, W)
    assert jnp.allclose(out, ref, atol=1e-5, rtol=1e-5)

    # Extra coverage: channel-chunked (large-C fallback) path.
    x2 = jax.random.normal(jax.random.PRNGKey(1), (1, 6, 16, 16), jnp.float32)
    out2 = jax.block_until_ready(l2_norm_dim1(x2, force_c_chunk=2))
    ref2 = jnp.sqrt(jnp.sum(x2 * x2, axis=1))
    assert jnp.allclose(out2, ref2, atol=1e-5, rtol=1e-5)

    # Extra coverage: spatial extent not a multiple of 128 (pad path).
    x3 = jax.random.normal(jax.random.PRNGKey(2), (2, 3, 9, 9), jnp.float32)
    out3 = jax.block_until_ready(l2_norm_dim1(x3))
    ref3 = jnp.sqrt(jnp.sum(x3 * x3, axis=1))
    assert jnp.allclose(out3, ref3, atol=1e-5, rtol=1e-5)

    print("KERNEL_OK")
</pallas_src>

<mosaic_0001>
module attributes {stable_mosaic.version = 11 : i64} {
  func.func @kernel(%arg0: i32, %arg1: i32, %arg2: memref<1x4x1x256xf32, #tpu.memory_space<vmem>>, %arg3: memref<1x1x256xf32, #tpu.memory_space<vmem>>) attributes {dimension_semantics = [#tpu.dimension_semantics<parallel>, #tpu.dimension_semantics<parallel>], iteration_bounds = array<i64: 2, 1>, scalar_prefetch = 0 : i64, scratch_operands = 0 : i64, tpu.core_type = #tpu.core_type<tc>, window_params = [{transform_indices = @transform_0, window_bounds = array<i64: 1, 4, 1, 256>}, {transform_indices = @transform_1, window_bounds = array<i64: 1, 1, 256>}]} {
    %cst = arith.constant 0.000000e+00 : f32
    %0 = vector.broadcast %cst : f32 to vector<1x256xf32>
    %c0 = arith.constant 0 : index
    %c0_0 = arith.constant 0 : index
    %c0_1 = arith.constant 0 : index
    %c0_2 = arith.constant 0 : index
    %1 = vector.load %arg2[%c0, %c0_0, %c0_1, %c0_2] : memref<1x4x1x256xf32, #tpu.memory_space<vmem>>, vector<1x1x1x256xf32>
    %2 = vector.shape_cast %1 : vector<1x1x1x256xf32> to vector<1x256xf32>
    %3 = arith.mulf %2, %2 : vector<1x256xf32>
    %4 = arith.addf %0, %3 : vector<1x256xf32>
    %c0_3 = arith.constant 0 : index
    %c1 = arith.constant 1 : index
    %c0_4 = arith.constant 0 : index
    %c0_5 = arith.constant 0 : index
    %5 = vector.load %arg2[%c0_3, %c1, %c0_4, %c0_5] : memref<1x4x1x256xf32, #tpu.memory_space<vmem>>, vector<1x1x1x256xf32>
    %6 = vector.shape_cast %5 : vector<1x1x1x256xf32> to vector<1x256xf32>
    %7 = arith.mulf %6, %6 : vector<1x256xf32>
    %8 = arith.addf %4, %7 : vector<1x256xf32>
    %c0_6 = arith.constant 0 : index
    %c2 = arith.constant 2 : index
    %c0_7 = arith.constant 0 : index
    %c0_8 = arith.constant 0 : index
    %9 = vector.load %arg2[%c0_6, %c2, %c0_7, %c0_8] : memref<1x4x1x256xf32, #tpu.memory_space<vmem>>, vector<1x1x1x256xf32>
    %10 = vector.shape_cast %9 : vector<1x1x1x256xf32> to vector<1x256xf32>
    %11 = arith.mulf %10, %10 : vector<1x256xf32>
    %12 = arith.addf %8, %11 : vector<1x256xf32>
    %c0_9 = arith.constant 0 : index
    %c3 = arith.constant 3 : index
    %c0_10 = arith.constant 0 : index
    %c0_11 = arith.constant 0 : index
    %13 = vector.load %arg2[%c0_9, %c3, %c0_10, %c0_11] : memref<1x4x1x256xf32, #tpu.memory_space<vmem>>, vector<1x1x1x256xf32>
    %14 = vector.shape_cast %13 : vector<1x1x1x256xf32> to vector<1x256xf32>
    %15 = arith.mulf %14, %14 : vector<1x256xf32>
    %16 = arith.addf %12, %15 : vector<1x256xf32>
    %17 = math.sqrt %16 : vector<1x256xf32>
    %c0_12 = arith.constant 0 : index
    %c0_13 = arith.constant 0 : index
    %c0_14 = arith.constant 0 : index
    %18 = vector.load %arg3[%c0_12, %c0_13, %c0_14] : memref<1x1x256xf32, #tpu.memory_space<vmem>>, vector<1x1x256xf32>
    %19 = vector.shape_cast %18 : vector<1x1x256xf32> to vector<1x256xf32>
    %20 = vector.shape_cast %17 : vector<1x256xf32> to vector<1x1x256xf32>
    tpu.vector_store %arg3[%c0_12, %c0_13, %c0_14], %20 {strides = array<i32>} : memref<1x1x256xf32, #tpu.memory_space<vmem>>, vector<1x1x256xf32>,
    return
  }
  func.func @transform_0(%arg0: i32, %arg1: i32) -> (i32, i32, i32, i32) {
    %c0_i32 = arith.constant 0 : i32
    %c0_i32_0 = arith.constant 0 : i32
    %c0_i32_1 = arith.constant 0 : i32
    return %arg0, %c0_i32, %arg1, %c0_i32_0 : i32, i32, i32, i32
  }
  func.func @transform_1(%arg0: i32, %arg1: i32) -> (i32, i32, i32) {
    %c0_i32 = arith.constant 0 : i32
    %c0_i32_0 = arith.constant 0 : i32
    return %arg0, %arg1, %c0_i32 : i32, i32, i32
  }
}

</mosaic_0001>

<bundles_post_ra>
// kernel: tpu_custom_call.1
= control target key start
LH: loop header
LB: loop body
LE: loop exit
PB: predicated region body
PF: predicated region fallthrough
CT: control target
= control target key end

     0   :  { %6 = vsyncpa [#allocation3], 0  ;;  %s630_s0 = inlined_call_operand.hbm [shape: f32[2,4,1,256], index: 0, kind: input, shape index: {}]   ;;  %s631_s1 = inlined_call_operand.hbm [shape: f32[2,1,256], index: 1, kind: output, shape index: {}]  }
   0x1   :  { %8 = vsyncpa [#allocation3 + $0x1], 0 }
   0x2   :  { %9 = vsyncpa [#allocation4], 0 }
   0x3   :  { %11 = vsyncpa [#allocation4 + $0x1], 0  ;;  %s491_s6 = smov 0   ;;  %s493_s7 = smov 0  }
   0x4   :  { %s495_s8 = smov 0   ;;  %s497_s9 = smov 0  }
   0x5   :  { %s499_s10 = smov 0   ;;  %s501_s11 = smov 0  }
   0x6 LB: > { %s281_s12 = sadd.s32 4294967295, %s475_s11   ;;  %s282_s13 = sadd.s32 4294967294, %s475_s11   ;;  %s475_s11 = sphi %s501_s11, %s17_s11   ;;  %s471_s10 = sphi %s499_s10, %s642_s10   ;;  %s467_s9 = sphi %s497_s9, %s641_s9   ;;  %s463_s8 = sphi %s495_s8, %s640_s8   ;;  %s459_s7 = sphi %s493_s7, %s639_s7   ;;  %s455_s6 = sphi %s491_s6, %s638_s6  }
   0x7   : > { %s29_s14 = sadd.s32 1, %s471_s10  ;;  %s38_s15 = sadd.s32 1, %s463_s8 }
   0x8   : > { %p31_p0 = scmp.ge.s32.totalorder %s29_s14, 2  ;;  %p45_p1 = scmp.ne.s32.totalorder %s463_s8, %s459_s7 }
   0x9   : > { %p46_p2 = scmp.eq.s32.totalorder %s475_s11, 0  ;;  %p51_p3 = scmp.ne.s32.totalorder %s459_s7, %s455_s6 }
   0xa   : > { %s644_s14 = smov (%p31_p0, %s29_s14), 0  ;;  %p52_p5 = scmp.eq.s32.totalorder %s281_s12, 0 }
   0xb   : > { %p532_p4 = por %p46_p2, %p45_p1  ;;  %s33_s17 = ssub.s32 %s471_s10, %s644_s14 }
   0xc   : > { %p77_p6 = scmp.eq.s32.totalorder %s281_s12, 1  ;;  %p36_p7 = scmp.eq.s32.totalorder %s33_s17, 0 }
   0xd   : > { %p538_p8 = por %p52_p5, %p51_p3  ;;  %p83_p10 = scmp.eq.s32.totalorder %s282_s13, 1 }
   0xe   : > { %p542_p9 = por %p77_p6, %p45_p1  ;;  %p313_p13 = scmp.lt.s32.totalorder %s475_s11, 2 }
   0xf   : > { %s547_s20 = scalar_select %p36_p7, %s463_s8, %s38_s15  }
  0x10   : > { %p549_p11 = por %p83_p10, %p51_p3  ;;  %s103_s22 = sand.u32 1, %s463_s8  }
  0x11   : > { %s285_s23 = sshll.u32 %s103_s22, 3  ;;  %s299_s24 = sshll.u32 %s471_s10, 7 }
  0x12   : > { %s115_s27 = scalar_lea.hbm %s630_s0, %s299_s24  ;;  %s107_s28 = scalar_lea.vmem [#allocation2], %s285_s23 }
  0x13   : > { %s116_s29 = sshll.u32 %s107_s28, 4  ;;  %p562_p0 = pnand %p313_p13, %p532_p4  ;;  %s117_s29 = int_to_ptr.vmem [resolvable:$true] %s116_s29 }
  0x14   : > { %p288_p1 = scmp.ge.s32.totalorder %s475_s11, 1  ;;  %s104_s2 = scalar_lea.sflag [#allocation3], %s103_s22 }
  0x15   : > { %p369_p2 = pneg %p562_p0  ;;  %s380_s3 = scalar_lea.vmem %s117_s29, 128 }
  0x16   : > { %p381_p3 = scmp.ne.s32.totalorder %s117_s29, %s380_s3  ;;  %s477_s4 = smov [#allocation2]  }
  0x17   : > { %s385_s5 = sshll.u32 %s477_s4, 4  ;;  %s386_s5 = int_to_ptr.vmem [resolvable:$false] %s385_s5 }
  0x18   : > { %p383_p5 = pnand %p381_p3, %p369_p2  ;;  %s387_s12 = scalar_lea.vmem %s386_s5, 256 }
  0x19   : > { %p388_p7 = scmp.lt.s32.totalorder %s117_s29, %s386_s5  ;;  %p389_p10 = scmp.lt.s32.totalorder %s387_s12, %s380_s3 }
  0x1a   : > { %p384_p6 = pneg %p383_p5 }
  0x1b   : > { %p390_p12 = por %p389_p10, %p388_p7 }
  0x1d   : > { %p391_p4 = pnand %p390_p12, %p384_p6 }
  0x1f   : > { %394 = shalt.err (!%p391_p4)
}
  0x20   : > { %s478_s13 = smov 32   ;;  %s479_s15 = smov 2  }
  0x21   : > { %308 = dma.hbm_to_vmem [thread:$0]  (!%p562_p0), %s115_s27, 128, %s117_s29, %s104_s2, %s478_s13, %s478_s13, %s479_s15  }
  0x22   : > { %p124_p13 = scmp.lt.s32.totalorder %s475_s11, 3 }
  0x24   : > { %p125_p2 = pnand %p288_p1, %p124_p13 }
  0x25   : > { %s575_s16 = sand.u32 (!%p125_p2), 1, %s459_s7  }
  0x26   : > { %128 = sbr.rel (%p125_p2) target bundleno = 84 (0x54), region = 24  ;;  %s289_s17 = sshll.u32 (!%p125_p2), %s575_s16, 3 }
  0x27   : > { %s131_s22 = scalar_lea.sflag (!%p125_p2), [#allocation3], %s575_s16  ;;  %s134_s23 = scalar_lea.vmem (!%p125_p2), [#allocation2], %s289_s17 }
  0x2b   : > { %446 = dma.done.wait (%p538_p8), %s131_s22, 128  }
  0x2c   : > { %448 = vsyncadd (%p538_p8), %s131_s22, 4294967168  ;;  %v153_v0 = vld [vmem:[%s134_s23] sm:$0x3]  ;;  %v291_v1 = vld [vmem:[%s134_s23 + $0x2] sm:$0x3]  ;;  %s290_s24 = sshll.u32 %s575_s16, 1  ;;  %v175_v11 = vlaneseq }
  0x2d   : > { %v292_v2 = vld [vmem:[%s134_s23 + $0x4] sm:$0x3]  ;;  %v154_v3 = vmul.f32 %v153_v0, %v153_v0  ;;  %v158_v4 = vmul.f32 %v291_v1, %v291_v1  ;;  %v293_v6 = vld [vmem:[%s134_s23 + $0x6] sm:$0x3]  ;;  %s152_s18 = scalar_lea.vmem [#allocation5], %s290_s24  ;;  %s300_s26 = sshll.u32 %s467_s9, 5 }
  0x2e   : > { %v162_v5 = vmul.f32 %v292_v2, %v292_v2  ;;  %v166_v8 = vmul.f32 %v293_v6, %v293_v6  ;;  %s197_s25 = sshll.u32 %s152_s18, 4  ;;  %vm177_vm2 = vcmp.lt.s32.totalorder %v175_v11, 256  ;;  %s195_s29 = scalar_lea.hbm %s631_s1, %s300_s26  ;;  %s585_s25 = int_to_ptr.vmem [resolvable:$true] %s197_s25 }
  0x2f   : > { %v159_v7 = vadd.f32 %v158_v4, %v154_v3  ;;  %s181_s30 = scalar_lea.sflag [#allocation4], %s575_s16  ;;  %s395_s2 = scalar_lea.vmem %s585_s25, 32 }
  0x30   : > { %p396_p8 = scmp.ne.s32.totalorder %s585_s25, %s395_s2  ;;  %s480_s9 = smov [#allocation5]  }
  0x31   : > { %v163_v9 = vadd.f32 %v162_v5, %v159_v7  ;;  %s399_s3 = sshll.u32 %s480_s9, 4  ;;  %s400_s3 = int_to_ptr.vmem [resolvable:$false] %s399_s3 }
  0x32   : > { %p397_p12 = pnand %p396_p8, %p542_p9  ;;  %s401_s4 = scalar_lea.vmem %s400_s3, 64 }
  0x33   : > { %v167_v10 = vadd.f32 %v166_v8, %v163_v9  ;;  %p402_p1 = scmp.lt.s32.totalorder %s585_s25, %s400_s3  ;;  %p403_p3 = scmp.lt.s32.totalorder %s401_s4, %s395_s2 }
  0x34   : > { %p398_p0 = pneg %p397_p12 }
  0x35   : > { %365 = vrsqrt.f32 %v167_v10  ;;  %vm170_vm0 = vcmp.eq.f32.partialorder %v167_v10, inf  ;;  %v173_v13 = vand.u32 2147483648, %v167_v10  ;;  %vm172_vm1 = vcmp.eq.f32.partialorder %v167_v10, 0.0  ;;  %p404_p5 = por %p403_p3, %p402_p1 }
  0x37   : > { %p405_p6 = pnand %p404_p5, %p398_p0 }
  0x42   : > { %v366_v12 = vpop.eup %365 }
  0x43   : > { %v169_v14 = vmul.f32 %v366_v12, %v167_v10 }
  0x45   : > { %v171_v15 = vsel %vm170_vm0, %v167_v10, %v169_v14 }
  0x46   : > { %v174_v16 = vsel %vm172_vm1, %v173_v13, %v171_v15 }
  0x47   : > { %179 = vst.msk [vmem:[%s152_s18] sm:$0x3] %vm177_vm2, %v174_v16 }
  0x48   : > { %408 = shalt.err (!%p405_p6)
}
  0x49   : > { %s409_s5 = scalar_lea.hbm %s195_s29, 32  ;;  %s413_s15 = scalar_lea.hbm %s631_s1, 64 }
  0x4a   : > { %p410_p7 = scmp.ne.s32.totalorder %s195_s29, %s409_s5  ;;  %p414_p13 = scmp.lt.s32.totalorder %s195_s29, %s631_s1 }
  0x4b   : > { %p415_p2 = scmp.lt.s32.totalorder %s413_s15, %s409_s5 }
  0x4c   : > { %p411_p10 = pnand %p410_p7, %p542_p9 }
  0x4d   : > { %p416_p8 = por %p415_p2, %p414_p13 }
  0x4e   : > { %p412_p4 = pneg %p411_p10 }
  0x50   : > { %p417_p12 = pnand %p416_p8, %p412_p4 }
  0x52   : > { %420 = shalt.err (!%p417_p12)
}
  0x53   : > { %303 = dma.vmem_to_hbm [thread:$0]  (%p542_p9), %s585_s25, 32, %s195_s29, %s181_s30  }
  0x54 PF: > { %s209_s22 = sand.u32 1, %s455_s6   ;;  %p637_p0 = scmp.ge.s32.totalorder %s475_s11, 2 }
  0x55   : > { %s210_s23 = scalar_lea.sflag [#allocation4], %s209_s22 }
  0x56   : > { %p310_p1 = pnand %p637_p0, %p549_p11 }
  0x58   : > { %p311_p3 = pneg %p310_p1 }
  0x5a   : > { %450 = dma.done.wait (%p311_p3), %s210_s23, 32  }
  0x5b   : > { %452 = vsyncadd (%p311_p3), %s210_s23, 4294967264  ;;  %s17_s11 = sadd.s32 1, %s475_s11   ;;  %s638_s6 = smov %s459_s7 }
  0x5c   : > { %p14_p5 = scmp.ge.s32.totalorder %s17_s11, 4   ;;  %s639_s7 = smov %s463_s8 }
  0x5d   : > { %s640_s8 = smov %s547_s20  ;;  %s641_s9 = smov %s471_s10 }
  0x5e   : > { %s642_s10 = smov %s644_s14  ;;  %16 = sbr.rel (!%p14_p5) target bundleno = 6 (0x6), region = 72 }
  0x63   :  { %215 = vsyncpa [#allocation3], 1 }
  0x64   :  { %217 = vsyncpa [#allocation3 + $0x1], 1 }
  0x65   :  { %218 = vsyncpa [#allocation4], 1 }
  0x66   :  { %220 = vsyncpa [#allocation4 + $0x1], 1 }

</bundles_post_ra>
